<compile_context>
chip_gen: v6e
topology: v6e:2x2x1
jax: 0.10.0
libtpu: 0.0.40
codegen_flags: <defaults>
</compile_context>

<pallas_src>
import jax
import jax.numpy as jnp
from jax.experimental import pallas as pl
from jax.experimental.pallas import tpu as pltpu

_LANE = 128              # vreg lane width: keep the last dim lane-dense.
_SUBLANE = 8             # row tiles stay a multiple of 8 sublanes.
_MIN_PALLAS_ELEMS = 1024  # below one (8,128) f32 tile, launch overhead dominates.


def _copy_kernel(x_ref, o_ref):
    # Straight tile pass-through: full-width vld/vst, no masking, no extra
    # VPU work (the vector-store slot / HBM bandwidth is the binding unit).
    o_ref[...] = x_ref[...]


def _chip_config():
    """Chip-aware (tile_bytes, vmem_limit_bytes, core_parallel) selection."""
    kind = ""
    try:
        kind = jax.devices()[0].device_kind.lower()
    except Exception:
        pass
    if ("v5 lite" in kind) or ("v5e" in kind) or ("v5litepod" in kind):
        # v5e: 16 MiB scoped-VMEM default -> raise explicitly. 4 MiB tiles
        # keep 2 in + 2 out live buffers at 16 MiB, under the raised limit.
        return 4 * 1024 * 1024, 32 * 1024 * 1024, False
    if "v7" in kind:
        # v7x: ~3.2 TB/s HBM but only 64 MiB physical VMEM (32 MiB scoped
        # default). 6 MiB tiles -> 24 MiB live (2 in + 2 out); shard the
        # row-tile axis across both TensorCores.
        return 6 * 1024 * 1024, 32 * 1024 * 1024, True
    # v6e / v4 / default: 128 MiB VMEM -> 8 MiB tiles, 64 MiB scoped limit.
    return 8 * 1024 * 1024, 64 * 1024 * 1024, False


def _pallas_identity_2d(x2d: jax.Array) -> jax.Array:
    rows, cols = x2d.shape
    itemsize = x2d.dtype.itemsize
    tile_bytes, vmem_limit, core_parallel = _chip_config()

    # Largest row tile (multiple of 8 sublanes) that fits the per-buffer budget;
    # small inputs use the full extent as a single block.
    max_tile_rows = max(_SUBLANE,
                        (tile_bytes // (cols * itemsize)) // _SUBLANE * _SUBLANE)
    tile_rows = rows if rows <= max_tile_rows else max_tile_rows
    grid = (pl.cdiv(rows, tile_rows),)

    if core_parallel and grid[0] >= 2:
        # v7x: actually split independent row tiles across both TensorCores.
        sem = (getattr(pltpu, "CORE_PARALLEL", None) or "parallel",)
    else:
        sem = ("parallel",)

    nbytes = rows * cols * itemsize
    return pl.pallas_call(
        _copy_kernel,
        out_shape=jax.ShapeDtypeStruct((rows, cols), x2d.dtype),
        grid=grid,
        in_specs=[pl.BlockSpec((tile_rows, cols), lambda i: (i, 0))],
        out_specs=pl.BlockSpec((tile_rows, cols), lambda i: (i, 0)),
        compiler_params=pltpu.CompilerParams(
            dimension_semantics=sem,
            vmem_limit_bytes=vmem_limit,
        ),
        # Purely HBM-bandwidth-bound: zero flops, read + write of the slab.
        cost_estimate=pl.CostEstimate(
            flops=0, transcendentals=0, bytes_accessed=2 * nbytes
        ),
    )(x2d)


@jax.jit
def base_nano_forward(x: jax.Array) -> jax.Array:
    """Identity forward of the (parameter-free) base nano-model via Pallas."""
    total = int(x.size)  # static under jit
    # Tiny or non-lane-aligned inputs: the base model's forward is a pure
    # pass-through, so return x directly instead of paying pad/slice HBM
    # traffic or per-step grid overhead for an 8-KiB-class copy.
    if total < _MIN_PALLAS_ELEMS or total % _LANE != 0:
        return x
    # Lane-dense slab (-1, 128): every vreg store is a full unmasked 128-lane vst.
    out2d = _pallas_identity_2d(x.reshape(-1, _LANE))
    return out2d.reshape(x.shape)


class BaseNanoModelJAX:
    """JAX/Pallas mirror of the PyTorch BaseNanoModel base class."""

    def __init__(self, model_size: int = 5):
        self.model_size = model_size
        self.task_type = None
        # Base class declares no nn.Parameters -> empty parameter dict.
        self.params = {}

    def forward(self, x: jax.Array) -> jax.Array:
        return base_nano_forward(x)

    def get_model_size(self) -> float:
        # sum(p.numel() * p.element_size()) over zero parameters == 0 bytes.
        param_size = sum(
            int(p.size) * p.dtype.itemsize
            for p in jax.tree_util.tree_leaves(self.params)
        )
        return param_size / (1024 * 1024)

    def optimize(self) -> None:
        pass

    def get_metadata(self):
        return {
            "model_size": self.get_model_size(),
            "task_type": self.task_type,
            "architecture": self.__class__.__name__,
        }


if __name__ == "__main__":
    key = jax.random.PRNGKey(0)
    # Small NCHW input consistent with a nano vision-style model.
    # 2*4*16*16 = 2048 elements: 128-aligned and above the short-circuit
    # threshold, so the Pallas identity kernel is exercised.
    x = jax.random.normal(key, (2, 4, 16, 16), dtype=jnp.float32)

    model = BaseNanoModelJAX(model_size=5)
    y = model.forward(x)
    y = jax.block_until_ready(y)

    # Sanity: identity semantics, shape/dtype preserved, zero-param metadata.
    assert y.shape == x.shape and y.dtype == x.dtype
    assert bool(jnp.allclose(y, x))
    meta = model.get_metadata()
    assert meta["model_size"] == 0.0
    assert meta["architecture"] == "BaseNanoModelJAX"

    print("KERNEL_OK")
</pallas_src>

<mosaic_0001>
module attributes {stable_mosaic.version = 11 : i64} {
  func.func @_copy_kernel(%arg0: i32, %arg1: memref<16x128xf32, #tpu.memory_space<vmem>>, %arg2: memref<16x128xf32, #tpu.memory_space<vmem>>) attributes {dimension_semantics = [#tpu.dimension_semantics<parallel>], iteration_bounds = array<i64: 1>, scalar_prefetch = 0 : i64, scratch_operands = 0 : i64, tpu.core_type = #tpu.core_type<tc>, window_params = [{transform_indices = @transform_0, window_bounds = array<i64: 16, 128>}, {transform_indices = @transform_1, window_bounds = array<i64: 16, 128>}]} {
    %c0 = arith.constant 0 : index
    %c0_0 = arith.constant 0 : index
    %0 = vector.load %arg1[%c0, %c0_0] : memref<16x128xf32, #tpu.memory_space<vmem>>, vector<16x128xf32>
    %c0_1 = arith.constant 0 : index
    %c0_2 = arith.constant 0 : index
    %1 = vector.load %arg2[%c0_1, %c0_2] : memref<16x128xf32, #tpu.memory_space<vmem>>, vector<16x128xf32>
    tpu.vector_store %arg2[%c0_1, %c0_2], %0 {strides = array<i32>} : memref<16x128xf32, #tpu.memory_space<vmem>>, vector<16x128xf32>,
    return
  }
  func.func @transform_0(%arg0: i32) -> (i32, i32) {
    %c0_i32 = arith.constant 0 : i32
    %c0_i32_0 = arith.constant 0 : i32
    return %arg0, %c0_i32 : i32, i32
  }
  func.func @transform_1(%arg0: i32) -> (i32, i32) {
    %c0_i32 = arith.constant 0 : i32
    %c0_i32_0 = arith.constant 0 : i32
    return %arg0, %c0_i32 : i32, i32
  }
}

</mosaic_0001>

<bundles_post_ra>
// kernel: base_nano_forward.1
= control target key start
LH: loop header
LB: loop body
LE: loop exit
PB: predicated region body
PF: predicated region fallthrough
CT: control target
= control target key end

     0   :  { %s38_s0 = inlined_call_operand.vmem [shape: f32[16,128], index: 0, kind: input, shape index: {}]   ;;  %s39_s1 = inlined_call_operand.vmem [shape: f32[16,128], index: 1, kind: output, shape index: {}]  }
   0x1   :  { %v8_v0 = vld [vmem:[%s38_s0] sm:$0xff]  ;;  %v9_v1 = vld [vmem:[%s38_s0 + $0x8] sm:$0xff] }
   0x2   :  { %10 = vst [vmem:[%s39_s1] sm:$0xff] %v8_v0  ;;  %11 = vst [vmem:[%s39_s1 + $0x8] sm:$0xff] %v9_v1 }

</bundles_post_ra>
